<compile_context>
chip_gen: v7x
topology: tpu7x:2x2x1
jax: 0.10.0
libtpu: 0.0.40
codegen_flags: <defaults>
</compile_context>

<pallas_src>
import jax
import jax.numpy as jnp
from jax.experimental import pallas as pl
from jax.experimental.pallas import tpu as pltpu

IN_FEATURES = 4
HIDDEN = 256
HEAD_ROWS = 8                    # sublane-aligned output slab height
MU_ROW, VAL_ROW, STD_ROW = 0, 1, 2


def policy_kernel(xT_ref, w1T_ref, b1T_ref, whT_ref, bhT_ref, out_ref):
    # Hidden layer (transposed): (256, 4) @ (4, tb) + (256, 1) -> relu
    h = jnp.dot(w1T_ref[...], xT_ref[...], preferred_element_type=jnp.float32)
    h = jnp.maximum(h + b1T_ref[...], 0.0)

    # Fused action/value/std heads: (8, 256) @ (256, tb) + (8, 1).
    # The std row's weights are all zero, so its output is exactly the bias,
    # which the wrapper set to exp(log_std).
    out_ref[...] = (
        jnp.dot(whT_ref[...], h, preferred_element_type=jnp.float32) + bhT_ref[...]
    )


def _prep_params(w1, b1, wa, ba, wv, bv, log_std):
    """Build the transposed / fused parameter slabs consumed by the kernel."""
    w1_t = jnp.asarray(w1, jnp.float32).T                       # (256, 4)
    b1_t = jnp.asarray(b1, jnp.float32).reshape(HIDDEN, 1)      # (256, 1)

    wh_t = jnp.zeros((HEAD_ROWS, HIDDEN), jnp.float32)          # (8, 256)
    wh_t = wh_t.at[MU_ROW].set(jnp.asarray(wa, jnp.float32)[:, 0])
    wh_t = wh_t.at[VAL_ROW].set(jnp.asarray(wv, jnp.float32)[:, 0])

    bh_t = jnp.zeros((HEAD_ROWS, 1), jnp.float32)               # (8, 1)
    bh_t = bh_t.at[MU_ROW, 0].set(jnp.asarray(ba, jnp.float32).reshape(()))
    bh_t = bh_t.at[VAL_ROW, 0].set(jnp.asarray(bv, jnp.float32).reshape(()))
    # std folded into the bias (weights of the std row are zero).
    bh_t = bh_t.at[STD_ROW, 0].set(
        jnp.exp(jnp.asarray(log_std, jnp.float32).reshape(())))
    return w1_t, b1_t, wh_t, bh_t


def _round_up(n, m):
    return ((n + m - 1) // m) * m


def policy_forward(x, w1, b1, wa, ba, wv, bv, log_std, *, tb=4096):
    """x: (B, 4) f32. Returns (mu, std, value), each (B, 1) f32."""
    x = jnp.asarray(x, jnp.float32)
    B = x.shape[0]
    w1_t, b1_t, wh_t, bh_t = _prep_params(w1, b1, wa, ba, wv, bv, log_std)

    # Batch is the lane axis: tile must be a multiple of 128.  Pad B up to a
    # multiple of the tile so the grid always covers it (no giant fallback
    # tile); padded columns are computed and discarded by the wrapper slice.
    tb = max(128, _round_up(tb, 128))
    tb = min(tb, _round_up(B, 128))
    b_pad = _round_up(B, tb)
    if b_pad != B:
        x = jnp.pad(x, ((0, b_pad - B), (0, 0)))
    x_t = x.T                                                   # (4, b_pad)

    out = pl.pallas_call(
        policy_kernel,
        out_shape=jax.ShapeDtypeStruct((HEAD_ROWS, b_pad), jnp.float32),
        grid=(b_pad // tb,),
        in_specs=[
            pl.BlockSpec((IN_FEATURES, tb), lambda i: (0, i)),     # x^T (tiled, lane-dense)
            pl.BlockSpec((HIDDEN, IN_FEATURES), lambda i: (0, 0)),  # W1^T  (resident)
            pl.BlockSpec((HIDDEN, 1), lambda i: (0, 0)),            # b1^T  (resident)
            pl.BlockSpec((HEAD_ROWS, HIDDEN), lambda i: (0, 0)),    # fused head W^T
            pl.BlockSpec((HEAD_ROWS, 1), lambda i: (0, 0)),         # fused head b (incl. std)
        ],
        out_specs=pl.BlockSpec((HEAD_ROWS, tb), lambda i: (0, i)),
        compiler_params=pltpu.CompilerParams(
            dimension_semantics=("parallel",)),
    )(x_t, w1_t, b1_t, wh_t, bh_t)

    mu = out[MU_ROW, :B][:, None]
    std = out[STD_ROW, :B][:, None]
    val = out[VAL_ROW, :B][:, None]
    return mu, std, val


def init_params(key, std=0.0):
    """Deterministic init mimicking nn.Linear default (uniform +/- 1/sqrt(fan_in)).

    Weights are stored as (in, out) == transpose of PyTorch's (out, in); real
    PyTorch checkpoints must be transposed before use.
    """
    k1, k2, k3, k4, k5, k6 = jax.random.split(key, 6)

    def linear(kw, kb, fan_in, fan_out):
        bound = 1.0 / jnp.sqrt(jnp.float32(fan_in))
        w = jax.random.uniform(kw, (fan_in, fan_out), jnp.float32, -bound, bound)
        b = jax.random.uniform(kb, (1, fan_out), jnp.float32, -bound, bound)
        return w, b

    w1, b1 = linear(k1, k2, IN_FEATURES, HIDDEN)   # affine1
    wa, ba = linear(k3, k4, HIDDEN, 1)             # action_head
    wv, bv = linear(k5, k6, HIDDEN, 1)             # value_head
    log_std = jnp.full((1, 1), std, dtype=jnp.float32)  # nn.Parameter(ones(1)*std)
    return w1, b1, wa, ba, wv, bv, log_std


def reference_forward(x, w1, b1, wa, ba, wv, bv, log_std):
    h = jnp.maximum(x @ w1 + b1, 0.0)
    mu = h @ wa + ba
    std = jnp.exp(log_std) * jnp.ones_like(mu)
    val = h @ wv + bv
    return mu, std, val


if __name__ == "__main__":
    key = jax.random.PRNGKey(0)
    kx, kp = jax.random.split(key)

    B = 8
    x = jax.random.normal(kx, (B, IN_FEATURES), dtype=jnp.float32)
    params = init_params(kp, std=0.0)

    fwd = jax.jit(policy_forward)
    mu, std, val = fwd(x, *params)
    jax.block_until_ready((mu, std, val))

    # sanity check against pure-JAX reference
    mu_r, std_r, val_r = reference_forward(x, *params)
    assert mu.shape == (B, 1) and std.shape == (B, 1) and val.shape == (B, 1)
    assert jnp.allclose(mu, mu_r, atol=1e-5)
    assert jnp.allclose(std, std_r, atol=1e-5)
    assert jnp.allclose(val, val_r, atol=1e-5)

    print("KERNEL_OK")
</pallas_src>

<mosaic_0001>
module attributes {stable_mosaic.version = 11 : i64} {
  func.func @policy_kernel(%arg0: i32, %arg1: memref<4x128xf32, #tpu.memory_space<vmem>>, %arg2: memref<256x4xf32, #tpu.memory_space<vmem>>, %arg3: memref<256x1xf32, #tpu.memory_space<vmem>>, %arg4: memref<8x256xf32, #tpu.memory_space<vmem>>, %arg5: memref<8x1xf32, #tpu.memory_space<vmem>>, %arg6: memref<8x128xf32, #tpu.memory_space<vmem>>) attributes {dimension_semantics = [#tpu.dimension_semantics<parallel>], iteration_bounds = array<i64: 1>, scalar_prefetch = 0 : i64, scratch_operands = 0 : i64, tpu.core_type = #tpu.core_type<tc>, window_params = [{transform_indices = @transform_0, window_bounds = array<i64: 4, 128>}, {pipeline_mode = #tpu.pipeline_mode<synchronous>, transform_indices = @transform_1, window_bounds = array<i64: 256, 4>}, {pipeline_mode = #tpu.pipeline_mode<synchronous>, transform_indices = @transform_2, window_bounds = array<i64: 256, 1>}, {pipeline_mode = #tpu.pipeline_mode<synchronous>, transform_indices = @transform_3, window_bounds = array<i64: 8, 256>}, {pipeline_mode = #tpu.pipeline_mode<synchronous>, transform_indices = @transform_4, window_bounds = array<i64: 8, 1>}, {transform_indices = @transform_5, window_bounds = array<i64: 8, 128>}]} {
    %c0 = arith.constant 0 : index
    %c0_0 = arith.constant 0 : index
    %0 = vector.load %arg2[%c0, %c0_0] : memref<256x4xf32, #tpu.memory_space<vmem>>, vector<256x4xf32>
    %c0_1 = arith.constant 0 : index
    %c0_2 = arith.constant 0 : index
    %1 = vector.load %arg1[%c0_1, %c0_2] : memref<4x128xf32, #tpu.memory_space<vmem>>, vector<4x128xf32>
    %cst = arith.constant dense<0.000000e+00> : vector<256x128xf32>
    %2 = tpu.matmul %0, %1, %cst {dimension_numbers = #tpu.dot_dimension_numbers<[1], [0], [0], [1], [0, 0, 1, 1], [], []>} : vector<256x4xf32>, vector<4x128xf32>, vector<256x128xf32> -> vector<256x128xf32>
    %c0_3 = arith.constant 0 : index
    %c0_4 = arith.constant 0 : index
    %3 = vector.load %arg3[%c0_3, %c0_4] : memref<256x1xf32, #tpu.memory_space<vmem>>, vector<256x1xf32>
    %4 = vector.broadcast %3 : vector<256x1xf32> to vector<256x128xf32>
    %5 = arith.addf %2, %4 : vector<256x128xf32>
    %cst_5 = arith.constant 0.000000e+00 : f32
    %6 = vector.broadcast %cst_5 : f32 to vector<256x128xf32>
    %7 = arith.maximumf %5, %6 : vector<256x128xf32>
    %c0_6 = arith.constant 0 : index
    %c0_7 = arith.constant 0 : index
    %8 = vector.load %arg4[%c0_6, %c0_7] : memref<8x256xf32, #tpu.memory_space<vmem>>, vector<8x256xf32>
    %cst_8 = arith.constant dense<0.000000e+00> : vector<8x128xf32>
    %9 = tpu.matmul %8, %7, %cst_8 {dimension_numbers = #tpu.dot_dimension_numbers<[1], [0], [0], [1], [0, 0, 1, 1], [], []>} : vector<8x256xf32>, vector<256x128xf32>, vector<8x128xf32> -> vector<8x128xf32>
    %c0_9 = arith.constant 0 : index
    %c0_10 = arith.constant 0 : index
    %10 = vector.load %arg5[%c0_9, %c0_10] : memref<8x1xf32, #tpu.memory_space<vmem>>, vector<8x1xf32>
    %11 = vector.broadcast %10 : vector<8x1xf32> to vector<8x128xf32>
    %12 = arith.addf %9, %11 : vector<8x128xf32>
    %c0_11 = arith.constant 0 : index
    %c0_12 = arith.constant 0 : index
    %13 = vector.load %arg6[%c0_11, %c0_12] : memref<8x128xf32, #tpu.memory_space<vmem>>, vector<8x128xf32>
    tpu.vector_store %arg6[%c0_11, %c0_12], %12 {strides = array<i32>} : memref<8x128xf32, #tpu.memory_space<vmem>>, vector<8x128xf32>,
    return
  }
  func.func @transform_0(%arg0: i32) -> (i32, i32) {
    %c0_i32 = arith.constant 0 : i32
    %c0_i32_0 = arith.constant 0 : i32
    return %c0_i32, %arg0 : i32, i32
  }
  func.func @transform_1(%arg0: i32) -> (i32, i32) {
    %c0_i32 = arith.constant 0 : i32
    %c0_i32_0 = arith.constant 0 : i32
    %c0_i32_1 = arith.constant 0 : i32
    return %c0_i32, %c0_i32_0 : i32, i32
  }
  func.func @transform_2(%arg0: i32) -> (i32, i32) {
    %c0_i32 = arith.constant 0 : i32
    %c0_i32_0 = arith.constant 0 : i32
    %c0_i32_1 = arith.constant 0 : i32
    return %c0_i32, %c0_i32_0 : i32, i32
  }
  func.func @transform_3(%arg0: i32) -> (i32, i32) {
    %c0_i32 = arith.constant 0 : i32
    %c0_i32_0 = arith.constant 0 : i32
    %c0_i32_1 = arith.constant 0 : i32
    return %c0_i32, %c0_i32_0 : i32, i32
  }
  func.func @transform_4(%arg0: i32) -> (i32, i32) {
    %c0_i32 = arith.constant 0 : i32
    %c0_i32_0 = arith.constant 0 : i32
    %c0_i32_1 = arith.constant 0 : i32
    return %c0_i32, %c0_i32_0 : i32, i32
  }
  func.func @transform_5(%arg0: i32) -> (i32, i32) {
    %c0_i32 = arith.constant 0 : i32
    %c0_i32_0 = arith.constant 0 : i32
    return %c0_i32, %arg0 : i32, i32
  }
}

</mosaic_0001>

<bundles_post_ra>
// kernel: policy_forward.1
= control target key start
LH: loop header
LB: loop body
LE: loop exit
PB: predicated region body
PF: predicated region fallthrough
CT: control target
= control target key end

     0   :  { %vm342_vm0 = vcmask 1043456   ;;  %vm245_vm1 = vcmask 31744   ;;  %v872_v3 = vmov 0   ;;  %s1214_s0 = inlined_call_operand.vmem [shape: f32[4,128], index: 0, kind: input, shape index: {}]   ;;  %s1215_s1 = inlined_call_operand.vmem [shape: f32[256,4], index: 1, kind: input, shape index: {}]   ;;  %s1216_s2 = inlined_call_operand.vmem [shape: f32[256,1], index: 2, kind: input, shape index: {}]   ;;  %s1217_s4 = inlined_call_operand.vmem [shape: f32[8,1], index: 4, kind: input, shape index: {}]   ;;  %s1218_s3 = inlined_call_operand.vmem [shape: f32[8,256], index: 3, kind: input, shape index: {}]   ;;  %s1219_s5 = inlined_call_operand.vmem [shape: f32[8,128], index: 5, kind: output, shape index: {}]  }
   0x1   :  { %v52_v0 = vld [vmem:[%s1214_s0] sm:$0xf]  ;;  %v21_v2 = vld [vmem:[%s1215_s1 + $0x8] sm:$0xff]  ;;  %870 = vset.pattern.permute.xlu0 %v872_v3  ;;  %871 = vset.pattern.permute.xlu1 %v872_v3  ;;  %v22_v4 = vld [vmem:[%s1215_s1 + $0x10] sm:$0xff] }
   0x2   :  { %v20_v1 = vld [vmem:[%s1215_s1] sm:$0xff]  ;;  %787 = vmatprep.subr.msk.mxu0 %vm342_vm0, %v52_v0  ;;  %v23_v5 = vld [vmem:[%s1215_s1 + $0x18] sm:$0xff]  ;;  %v70_v9 = vld [vmem:[%s1216_s2 + $0x88] sm:$0xff] }
   0x3   :  { %789 = vmatprep.mubr.msk.f32.mxu0 %vm245_vm1, %v20_v1  ;;  %788 = vmatpush3.msk.msra.mxu0 %vm342_vm0, %v52_v0  ;;  %v69_v6 = vld [vmem:[%s1216_s2 + $0x80] sm:$0xff]  ;;  %v54_v10 = vld [vmem:[%s1216_s2 + $0x8] sm:$0xff]  ;;  %v26_v12 = vld [vmem:[%s1215_s1 + $0x30] sm:$0xff] }
   0x4   :  { %790 = vmatmul.mubr.msk.f32.vlgmr.msra.gmra.mrb[0].mxu0 %vm245_vm1, %v21_v2  ;;  %v24_v7 = vld [vmem:[%s1215_s1 + $0x20] sm:$0xff]  ;;  %167 = vperm.xlu0 %870, %v69_v6   ;;  %v25_v11 = vld [vmem:[%s1215_s1 + $0x28] sm:$0xff]  ;;  %v71_v13 = vld [vmem:[%s1216_s2 + $0x90] sm:$0xff] }
   0x5   :  { %792 = vmatprep.mubr.msk.f32.mxu0 %vm245_vm1, %v22_v4  ;;  %v53_v8 = vld [vmem:[%s1216_s2] sm:$0xff]  ;;  %v72_v14 = vld [vmem:[%s1216_s2 + $0x98] sm:$0xff]  ;;  %v55_v17 = vld [vmem:[%s1216_s2 + $0x10] sm:$0xff] }
   0x6   :  { %87 = vperm.xlu1 %871, %v53_v8   ;;  %v27_v15 = vld [vmem:[%s1215_s1 + $0x38] sm:$0xff]  ;;  %v28_v16 = vld [vmem:[%s1215_s1 + $0x40] sm:$0xff]  ;;  %v29_v19 = vld [vmem:[%s1215_s1 + $0x48] sm:$0xff] }
   0x7   :  { %v56_v18 = vld [vmem:[%s1216_s2 + $0x18] sm:$0xff]  ;;  %v30_v20 = vld [vmem:[%s1215_s1 + $0x50] sm:$0xff]  ;;  %v73_v21 = vld [vmem:[%s1216_s2 + $0xa0] sm:$0xff] }
   0x8   :  { %793 = vmatmul.mubr.msk.f32.gmra.mrb[2].mxu0 %vm245_vm1, %v23_v5  ;;  %172 = vperm.xlu0 %870, %v70_v9   ;;  %v74_v22 = vld [vmem:[%s1216_s2 + $0xa8] sm:$0xff]  ;;  %v31_v23 = vld [vmem:[%s1215_s1 + $0x58] sm:$0xff]  ;;  %v32_v24 = vld [vmem:[%s1215_s1 + $0x60] sm:$0xff] }
   0x9   :  { %795 = vmatprep.mubr.msk.f32.mxu0 %vm245_vm1, %v24_v7  ;;  %v57_v25 = vld [vmem:[%s1216_s2 + $0x20] sm:$0xff]  ;;  %v58_v26 = vld [vmem:[%s1216_s2 + $0x28] sm:$0xff]  ;;  %v34_v28 = vld [vmem:[%s1215_s1 + $0x70] sm:$0xff] }
   0xa   :  { %92 = vperm.xlu1 %871, %v54_v10   ;;  %v33_v27 = vld [vmem:[%s1215_s1 + $0x68] sm:$0xff]  ;;  %v75_v29 = vld [vmem:[%s1216_s2 + $0xb0] sm:$0xff]  ;;  %v76_v30 = vld [vmem:[%s1216_s2 + $0xb8] sm:$0xff] }
   0xb   :  { %v35_v31 = vld [vmem:[%s1215_s1 + $0x78] sm:$0xff]  ;;  %v36_v32 = vld [vmem:[%s1215_s1 + $0x80] sm:$0xff]  ;;  %v59_v33 = vld [vmem:[%s1216_s2 + $0x30] sm:$0xff] }
   0xc   :  { %796 = vmatmul.mubr.msk.f32.gmra.mrb[4].mxu0 %vm245_vm1, %v25_v11  ;;  %177 = vperm.xlu0 %870, %v71_v13   ;;  %v60_v34 = vld [vmem:[%s1216_s2 + $0x38] sm:$0xff]  ;;  %v37_v35 = vld [vmem:[%s1215_s1 + $0x88] sm:$0xff]  ;;  %v38_v36 = vld [vmem:[%s1215_s1 + $0x90] sm:$0xff] }
   0xd   :  { %798 = vmatprep.mubr.msk.f32.mxu0 %vm245_vm1, %v26_v12  ;;  %v77_v37 = vld [vmem:[%s1216_s2 + $0xc0] sm:$0xff]  ;;  %v78_v38 = vld [vmem:[%s1216_s2 + $0xc8] sm:$0xff]  ;;  %v39_v39 = vld [vmem:[%s1215_s1 + $0x98] sm:$0xff] }
   0xe   :  { %182 = vperm.xlu1 %871, %v72_v14   ;;  %v40_v40 = vld [vmem:[%s1215_s1 + $0xa0] sm:$0xff]  ;;  %v62_v42 = vld [vmem:[%s1216_s2 + $0x48] sm:$0xff]  ;;  %v42_v44 = vld [vmem:[%s1215_s1 + $0xb0] sm:$0xff] }
   0xf   :  { %v61_v41 = vld [vmem:[%s1216_s2 + $0x40] sm:$0xff]  ;;  %v41_v43 = vld [vmem:[%s1215_s1 + $0xa8] sm:$0xff]  ;;  %v79_v45 = vld [vmem:[%s1216_s2 + $0xd0] sm:$0xff] }
  0x10   :  { %799 = vmatmul.mubr.msk.f32.gmra.mrb[6].mxu0 %vm245_vm1, %v27_v15  ;;  %97 = vperm.xlu0 %870, %v55_v17   ;;  %v80_v46 = vld [vmem:[%s1216_s2 + $0xd8] sm:$0xff]  ;;  %v44_v48 = vld [vmem:[%s1215_s1 + $0xc0] sm:$0xff]  ;;  %v63_v49 = vld [vmem:[%s1216_s2 + $0x50] sm:$0xff] }
  0x11   :  { %801 = vmatprep.mubr.msk.f32.mxu0 %vm245_vm1, %v28_v16  ;;  %v43_v47 = vld [vmem:[%s1215_s1 + $0xb8] sm:$0xff]  ;;  %v45_v51 = vld [vmem:[%s1215_s1 + $0xc8] sm:$0xff]  ;;  %v46_v52 = vld [vmem:[%s1215_s1 + $0xd0] sm:$0xff] }
  0x12   :  { %102 = vperm.xlu1 %871, %v56_v18   ;;  %v64_v50 = vld [vmem:[%s1216_s2 + $0x58] sm:$0xff]  ;;  %v81_v53 = vld [vmem:[%s1216_s2 + $0xe0] sm:$0xff]  ;;  %v82_v54 = vld [vmem:[%s1216_s2 + $0xe8] sm:$0xff] }
  0x13   :  { %v47_v55 = vld [vmem:[%s1215_s1 + $0xd8] sm:$0xff]  ;;  %v48_v56 = vld [vmem:[%s1215_s1 + $0xe0] sm:$0xff]  ;;  %v66_v58 = vld [vmem:[%s1216_s2 + $0x68] sm:$0xff] }
  0x14   :  { %802 = vmatmul.mubr.msk.f32.gmra.mrb[8].mxu0 %vm245_vm1, %v29_v19  ;;  %187 = vperm.xlu0 %870, %v73_v21   ;;  %v65_v57 = vld [vmem:[%s1216_s2 + $0x60] sm:$0xff]  ;;  %v49_v59 = vld [vmem:[%s1215_s1 + $0xe8] sm:$0xff]  ;;  %v50_v60 = vld [vmem:[%s1215_s1 + $0xf0] sm:$0xff] }
  0x15   :  { %804 = vmatprep.mubr.msk.f32.mxu0 %vm245_vm1, %v30_v20  ;;  %v83_v61 = vld [vmem:[%s1216_s2 + $0xf0] sm:$0xff]  ;;  %v84_v62 = vld [vmem:[%s1216_s2 + $0xf8] sm:$0xff]  ;;  %v605_v2 = vld [vmem:[%s1217_s4] sm:$0xff] }
  0x16   :  { %192 = vperm.xlu1 %871, %v74_v22   ;;  %v51_v63 = vld [vmem:[%s1215_s1 + $0xf8] sm:$0xff]  ;;  %v67_v0 = vld [vmem:[%s1216_s2 + $0x70] sm:$0xff]  ;;  %v604_v5 = vld [vmem:[%s1218_s3 + $0x8] sm:$0xff] }
  0x17   :  { %v68_v1 = vld [vmem:[%s1216_s2 + $0x78] sm:$0xff]  ;;  %675 = vmatprep.mubr.f32.mxu1 %v604_v5 }
  0x18   :  { %805 = vmatmul.mubr.msk.f32.gmra.mrb[10].mxu0 %vm245_vm1, %v31_v23  ;;  %107 = vperm.xlu0 %870, %v57_v25  }
  0x19   :  { %807 = vmatprep.mubr.msk.f32.mxu0 %vm245_vm1, %v32_v24 }
  0x1a   :  { %112 = vperm.xlu1 %871, %v58_v26  }
  0x1c   :  { %808 = vmatmul.mubr.msk.f32.gmra.mrb[12].mxu0 %vm245_vm1, %v33_v27  ;;  %197 = vperm.xlu0 %870, %v75_v29  }
  0x1d   :  { %810 = vmatprep.mubr.msk.f32.mxu0 %vm245_vm1, %v34_v28 }
  0x1e   :  { %202 = vperm.xlu1 %871, %v76_v30  }
  0x20   :  { %811 = vmatmul.mubr.msk.f32.gmra.mrb[14].mxu0 %vm245_vm1, %v35_v31  ;;  %117 = vperm.xlu0 %870, %v59_v33  }
  0x21   :  { %813 = vmatprep.mubr.msk.f32.mxu0 %vm245_vm1, %v36_v32 }
  0x22   :  { %122 = vperm.xlu1 %871, %v60_v34  }
  0x24   :  { %814 = vmatmul.mubr.msk.f32.gmra.mrb[16].mxu0 %vm245_vm1, %v37_v35  ;;  %207 = vperm.xlu0 %870, %v77_v37  }
  0x25   :  { %816 = vmatprep.mubr.msk.f32.mxu0 %vm245_vm1, %v38_v36 }
  0x26   :  { %212 = vperm.xlu1 %871, %v78_v38  }
  0x28   :  { %817 = vmatmul.mubr.msk.f32.gmra.mrb[18].mxu0 %vm245_vm1, %v39_v39  ;;  %127 = vperm.xlu0 %870, %v61_v41  }
  0x29   :  { %819 = vmatprep.mubr.msk.f32.mxu0 %vm245_vm1, %v40_v40 }
  0x2a   :  { %132 = vperm.xlu1 %871, %v62_v42  }
  0x2c   :  { %820 = vmatmul.mubr.msk.f32.gmra.mrb[20].mxu0 %vm245_vm1, %v41_v43  ;;  %217 = vperm.xlu0 %870, %v79_v45  }
  0x2d   :  { %822 = vmatprep.mubr.msk.f32.mxu0 %vm245_vm1, %v42_v44 }
  0x2e   :  { %222 = vperm.xlu1 %871, %v80_v46  }
  0x30   :  { %823 = vmatmul.mubr.msk.f32.gmra.mrb[22].mxu0 %vm245_vm1, %v43_v47  ;;  %137 = vperm.xlu0 %870, %v63_v49  }
  0x31   :  { %825 = vmatprep.mubr.msk.f32.mxu0 %vm245_vm1, %v44_v48 }
  0x32   :  { %142 = vperm.xlu1 %871, %v64_v50  }
  0x34   :  { %826 = vmatmul.mubr.msk.f32.gmra.mrb[24].mxu0 %vm245_vm1, %v45_v51  ;;  %227 = vperm.xlu0 %870, %v81_v53  }
  0x35   :  { %828 = vmatprep.mubr.msk.f32.mxu0 %vm245_vm1, %v46_v52 }
  0x36   :  { %232 = vperm.xlu1 %871, %v82_v54  }
  0x38   :  { %829 = vmatmul.mubr.msk.f32.gmra.mrb[26].mxu0 %vm245_vm1, %v47_v55  ;;  %147 = vperm.xlu0 %870, %v65_v57  }
  0x39   :  { %831 = vmatprep.mubr.msk.f32.mxu0 %vm245_vm1, %v48_v56 }
  0x3a   :  { %152 = vperm.xlu1 %871, %v66_v58  }
  0x3c   :  { %832 = vmatmul.mubr.msk.f32.gmra.mrb[28].mxu0 %vm245_vm1, %v49_v59  ;;  %237 = vperm.xlu0 %870, %v83_v61  }
  0x3d   :  { %834 = vmatprep.mubr.msk.f32.mxu0 %vm245_vm1, %v50_v60 }
  0x3e   :  { %242 = vperm.xlu1 %871, %v84_v62  }
  0x40   :  { %835 = vmatmul.mubr.msk.f32.gmra.mrb[30].mxu0 %vm245_vm1, %v51_v63  ;;  %157 = vperm.xlu0 %870, %v67_v0  }
  0x42   :  { %162 = vperm.xlu1 %871, %v68_v1  }
  0x44   :  { %608 = vperm.xlu0 %870, %v605_v2  }
  0x83   :  { %v1133_v4 = vpop.permute.xlu0 %167 }
  0x85   :  { %v88_v3 = vpop.permute.xlu1 %87 }
  0x87   :  { %v1138_v7 = vpop.permute.xlu0 %172 }
  0x89   :  { %v93_v6 = vpop.permute.xlu1 %92 }
  0x8b   :  { %v1142_v9 = vpop.permute.xlu0 %177 }
  0x8d   :  { %v1140_v8 = vpop.permute.xlu1 %182 }
  0x8f   :  { %v98_v11 = vpop.permute.xlu0 %97 }
  0x91   :  { %v103_v10 = vpop.permute.xlu1 %102 }
  0x93   :  { %v1146_v13 = vpop.permute.xlu0 %187 }
  0x95   :  { %v1144_v12 = vpop.permute.xlu1 %192 }
  0x97   :  { %v108_v15 = vpop.permute.xlu0 %107 }
  0x99   :  { %v113_v14 = vpop.permute.xlu1 %112 }
  0x9b   :  { %v1150_v17 = vpop.permute.xlu0 %197 }
  0x9d   :  { %v1148_v16 = vpop.permute.xlu1 %202 }
  0x9f   :  { %v118_v19 = vpop.permute.xlu0 %117 }
  0xa1   :  { %v123_v18 = vpop.permute.xlu1 %122 }
  0xa3   :  { %v1154_v21 = vpop.permute.xlu0 %207 }
  0xa5   :  { %v1152_v20 = vpop.permute.xlu1 %212 }
  0xa7   :  { %v128_v23 = vpop.permute.xlu0 %127 }
  0xa9   :  { %v133_v22 = vpop.permute.xlu1 %132 }
  0xab   :  { %v1158_v25 = vpop.permute.xlu0 %217 }
  0xad   :  { %v1156_v24 = vpop.permute.xlu1 %222 }
  0xaf   :  { %v138_v34 = vpop.permute.xlu0 %137 }
  0xb1   :  { %v143_v31 = vpop.permute.xlu1 %142 }
  0xb3   :  { %v1166_v47 = vpop.permute.xlu0 %227 }
  0xb5   :  { %v1162_v44 = vpop.permute.xlu1 %232 }
  0xb7   :  { %v148_v59 = vpop.permute.xlu0 %147 }
  0xb9   :  { %v153_v56 = vpop.permute.xlu1 %152 }
  0xd7   :  { %v791_v26 = vpop.f32.mrb[0].mxu0 }
  0xd8   :  { %v418_v27 = vadd.f32 %v791_v26, %v93_v6  ;;  %v412_v28 = vpop.f32.mrb[1].mxu0  ;;  %v1172_v6 = vpop.permute.xlu1 %242 }
  0xd9   :  { %v413_v29 = vadd.f32 %v412_v28, %v88_v3 }
  0xda   :  { %v572_v30 = vmax.f32 %v418_v27, 0.0 }
  0xdb   :  { %v571_v32 = vmax.f32 %v413_v29, 0.0  ;;  %v794_v33 = vpop.f32.mrb[2].mxu0 }
  0xdc   :  { %v428_v35 = vadd.f32 %v794_v33, %v103_v10  ;;  %v422_v36 = vpop.f32.mrb[3].mxu0  ;;  %v163_v29 = vpop.permute.xlu1 %162 }
  0xdd   :  { %v423_v37 = vadd.f32 %v422_v36, %v98_v11  ;;  %v1160_v38 = vpack.c.bf16 %v572_v30, %v571_v32 }
  0xde   :  { %v574_v39 = vmax.f32 %v428_v35, 0.0 }
  0xdf   :  { %v573_v40 = vmax.f32 %v423_v37, 0.0  ;;  %v797_v41 = vpop.f32.mrb[4].mxu0 }
  0xe0   :  { %v438_v42 = vadd.f32 %v797_v41, %v113_v14  ;;  %v432_v43 = vpop.f32.mrb[5].mxu0  ;;  %v1176_v14 = vpop.permute.xlu0 %237 }
  0xe1   :  { %v1164_v45 = vpack.c.bf16 %v574_v39, %v573_v40  ;;  %v433_v46 = vadd.f32 %v432_v43, %v108_v15 }
  0xe2   :  { %v576_v48 = vmax.f32 %v438_v42, 0.0 }
  0xe3   :  { %v575_v49 = vmax.f32 %v433_v46, 0.0  ;;  %v800_v50 = vpop.f32.mrb[6].mxu0 }
  0xe4   :  { %v448_v51 = vadd.f32 %v800_v50, %v123_v18  ;;  %v442_v52 = vpop.f32.mrb[7].mxu0  ;;  %v158_v32 = vpop.permute.xlu0 %157 }
  0xe5   :  { %v1168_v53 = vpack.c.bf16 %v576_v48, %v575_v49  ;;  %v443_v54 = vadd.f32 %v442_v52, %v118_v19 }
  0xe6   :  { %v578_v55 = vmax.f32 %v448_v51, 0.0 }
  0xe7   :  { %v577_v57 = vmax.f32 %v443_v54, 0.0  ;;  %v803_v58 = vpop.f32.mrb[8].mxu0 }
  0xe8   :  { %v458_v60 = vadd.f32 %v803_v58, %v133_v22  ;;  %v452_v61 = vpop.f32.mrb[9].mxu0 }
  0xe9   :  { %v1170_v62 = vpack.c.bf16 %v578_v55, %v577_v57  ;;  %v453_v63 = vadd.f32 %v452_v61, %v128_v23 }
  0xea   :  { %v580_v0 = vmax.f32 %v458_v60, 0.0 }
  0xeb   :  { %v579_v1 = vmax.f32 %v453_v63, 0.0  ;;  %v806_v2 = vpop.f32.mrb[10].mxu0 }
  0xec   :  { %v468_v3 = vadd.f32 %v806_v2, %v143_v31  ;;  %v462_v5 = vpop.f32.mrb[11].mxu0 }
  0xed   :  { %v1174_v10 = vpack.c.bf16 %v580_v0, %v579_v1  ;;  %v463_v11 = vadd.f32 %v462_v5, %v138_v34 }
  0xee   :  { %v582_v15 = vmax.f32 %v468_v3, 0.0 }
  0xef   :  { %v581_v18 = vmax.f32 %v463_v11, 0.0  ;;  %v809_v19 = vpop.f32.mrb[12].mxu0 }
  0xf0   :  { %v478_v22 = vadd.f32 %v809_v19, %v153_v56  ;;  %v472_v26 = vpop.f32.mrb[13].mxu0 }
  0xf1   :  { %v1178_v27 = vpack.c.bf16 %v582_v15, %v581_v18  ;;  %v473_v23 = vadd.f32 %v472_v26, %v148_v59 }
  0xf2   :  { %v584_v28 = vmax.f32 %v478_v22, 0.0 }
  0xf3   :  { %v583_v30 = vmax.f32 %v473_v23, 0.0  ;;  %v812_v31 = vpop.f32.mrb[14].mxu0 }
  0xf4   :  { %v488_v33 = vadd.f32 %v812_v31, %v163_v29  ;;  %v482_v35 = vpop.f32.mrb[15].mxu0 }
  0xf5   :  { %v1180_v36 = vpack.c.bf16 %v584_v28, %v583_v30  ;;  %v483_v34 = vadd.f32 %v482_v35, %v158_v32 }
  0xf6   :  { %v586_v37 = vmax.f32 %v488_v33, 0.0 }
  0xf7   :  { %v585_v39 = vmax.f32 %v483_v34, 0.0  ;;  %v815_v40 = vpop.f32.mrb[16].mxu0 }
  0xf8   :  { %v498_v41 = vadd.f32 %v815_v40, %v1138_v7  ;;  %v492_v42 = vpop.f32.mrb[17].mxu0 }
  0xf9   :  { %v1183_v43 = vpack.c.bf16 %v586_v37, %v585_v39  ;;  %v493_v46 = vadd.f32 %v492_v42, %v1133_v4  ;;  %v609_v39 = vpop.permute.xlu0 %608 }
  0xfa   :  { %v588_v48 = vmax.f32 %v498_v41, 0.0 }
  0xfb   :  { %v587_v49 = vmax.f32 %v493_v46, 0.0  ;;  %v818_v50 = vpop.f32.mrb[18].mxu0 }
  0xfc   :  { %v508_v51 = vadd.f32 %v818_v50, %v1140_v8  ;;  %v502_v52 = vpop.f32.mrb[19].mxu0 }
  0xfd   :  { %v503_v54 = vadd.f32 %v502_v52, %v1142_v9  ;;  %v837_v55 = vpack.c.bf16 %v588_v48, %v587_v49 }
  0xfe   :  { %v590_v56 = vmax.f32 %v508_v51, 0.0 }
  0xff   :  { %v589_v57 = vmax.f32 %v503_v54, 0.0  ;;  %v821_v58 = vpop.f32.mrb[20].mxu0  ;;  %838 = vmatprep.subr.bf16.mxu1 %v837_v55 }
 0x100   :  { %v518_v7 = vadd.f32 %v821_v58, %v1144_v12  ;;  %v512_v59 = vpop.f32.mrb[21].mxu0  ;;  %840 = vmatpush3.bf16.msra.mxu1 %v1160_v38 }
 0x101   :  { %v841_v60 = vpack.c.bf16 %v590_v56, %v589_v57  ;;  %v513_v4 = vadd.f32 %v512_v59, %v1146_v13 }
 0x102   :  { %v592_v61 = vmax.f32 %v518_v7, 0.0 }
 0x103   :  { %v591_v63 = vmax.f32 %v513_v4, 0.0  ;;  %v824_v0 = vpop.f32.mrb[22].mxu0  ;;  %842 = vmatprep.subr.bf16.mxu1 %v841_v60 }
 0x104   :  { %v528_v8 = vadd.f32 %v824_v0, %v1148_v16  ;;  %v522_v9 = vpop.f32.mrb[23].mxu0  ;;  %844 = vmatpush3.bf16.msra.mxu1 %v1164_v45 }
 0x105   :  { %v845_v1 = vpack.c.bf16 %v592_v61, %v591_v63  ;;  %v523_v2 = vadd.f32 %v522_v9, %v1150_v17 }
 0x106   :  { %v594_v3 = vmax.f32 %v528_v8, 0.0 }
 0x107   :  { %v593_v12 = vmax.f32 %v523_v2, 0.0  ;;  %v827_v5 = vpop.f32.mrb[24].mxu0  ;;  %846 = vmatprep.subr.bf16.mxu1 %v845_v1 }
 0x108   :  { %v538_v38 = vadd.f32 %v827_v5, %v1152_v20  ;;  %v532_v11 = vpop.f32.mrb[25].mxu0  ;;  %848 = vmatpush3.bf16.msra.mxu1 %v1168_v53 }
 0x109   :  { %v849_v13 = vpack.c.bf16 %v594_v3, %v593_v12  ;;  %v533_v15 = vadd.f32 %v532_v11, %v1154_v21 }
 0x10a   :  { %v596_v18 = vmax.f32 %v538_v38, 0.0 }
 0x10b   :  { %v595_v16 = vmax.f32 %v533_v15, 0.0  ;;  %v830_v19 = vpop.f32.mrb[26].mxu0  ;;  %850 = vmatprep.subr.bf16.mxu1 %v849_v13 }
 0x10c   :  { %v548_v45 = vadd.f32 %v830_v19, %v1156_v24  ;;  %v542_v22 = vpop.f32.mrb[27].mxu0  ;;  %852 = vmatpush3.bf16.msra.mxu1 %v1170_v62 }
 0x10d   :  { %v853_v17 = vpack.c.bf16 %v596_v18, %v595_v16  ;;  %v543_v26 = vadd.f32 %v542_v22, %v1158_v25 }
 0x10e   :  { %v598_v23 = vmax.f32 %v548_v45, 0.0 }
 0x10f   :  { %v597_v20 = vmax.f32 %v543_v26, 0.0  ;;  %v833_v28 = vpop.f32.mrb[28].mxu0  ;;  %854 = vmatprep.subr.bf16.mxu1 %v853_v17 }
 0x110   :  { %v558_v53 = vadd.f32 %v833_v28, %v1162_v44  ;;  %v552_v29 = vpop.f32.mrb[29].mxu0  ;;  %856 = vmatpush3.bf16.msra.mxu1 %v1174_v10 }
 0x111   :  { %v857_v21 = vpack.c.bf16 %v598_v23, %v597_v20  ;;  %v553_v30 = vadd.f32 %v552_v29, %v1166_v47  ;;  %v603_v47 = vld [vmem:[%s1218_s3] sm:$0xff] }
 0x112   :  { %v600_v31 = vmax.f32 %v558_v53, 0.0 }
 0x113   :  { %v599_v24 = vmax.f32 %v553_v30, 0.0  ;;  %v836_v32 = vpop.f32.mrb[30].mxu0  ;;  %858 = vmatprep.subr.bf16.mxu1 %v857_v21 }
 0x114   :  { %v568_v62 = vadd.f32 %v836_v32, %v1172_v6  ;;  %v562_v33 = vpop.f32.mrb[31].mxu0  ;;  %860 = vmatpush3.bf16.msra.mxu1 %v1178_v27 }
 0x115   :  { %v861_v25 = vpack.c.bf16 %v600_v31, %v599_v24  ;;  %v563_v35 = vadd.f32 %v562_v33, %v1176_v14 }
 0x116   :  { %v602_v34 = vmax.f32 %v568_v62, 0.0 }
 0x117   :  { %v601_v44 = vmax.f32 %v563_v35, 0.0  ;;  %862 = vmatprep.subr.bf16.mxu1 %v861_v25 }
 0x118   :  { %864 = vmatpush3.bf16.msra.mxu1 %v1180_v36 }
 0x119   :  { %v865_v10 = vpack.c.bf16 %v602_v34, %v601_v44 }
 0x11b   :  { %866 = vmatprep.subr.bf16.mxu1 %v865_v10 }
 0x11c   :  { %868 = vmatpush3.bf16.msra.mxu1 %v1183_v43 }
 0x11f   :  { %676 = vmatmul.mubr.f32.vlgmr.msra.gmra.mrb[0].mxu1 %v603_v47 }
 0x1f2   :  { %v784_v6 = vpop.f32.mrb[0].mxu1 }
 0x1f3   :  { %v785_v37 = vpop.f32.mrb[1].mxu1 }
 0x1f4   :  { %v786_v27 = vadd.f32 %v785_v37, %v784_v6 }
 0x1f6   :  { %v678_v40 = vadd.f32 %v786_v27, %v609_v39 }
 0x1f8   :  { %681 = vst [vmem:[%s1219_s5] sm:$0xff] %v678_v40 }

</bundles_post_ra>
